<compile_context>
chip_gen: v6e
topology: v6e:2x2x1
jax: 0.10.0
libtpu: 0.0.40
codegen_flags: <defaults>
</compile_context>

<pallas_src>
import jax
import jax.numpy as jnp
from jax.experimental import pallas as pl
from jax.experimental.pallas import tpu as pltpu


def _round_up(x, m):
    return ((x + m - 1) // m) * m


def _cdiv(a, b):
    return -(-a // b)


def _patch_embed_kernel(x_ref, w_ref, b_ref, o_ref):
    # x_ref: (tn, K)  im2col'd patch rows (flattened in (C, ph, pw) order), compute dtype
    # w_ref: (K, te)  conv-weight slab, compute dtype (VMEM-resident when te == Ep)
    # b_ref: (1, te)  bias, f32
    # o_ref: (tn, te) output tile (lane-dense: te % 128 == 0), out dtype
    acc = jnp.dot(x_ref[...], w_ref[...], preferred_element_type=jnp.float32)
    o_ref[...] = (acc + b_ref[...]).astype(o_ref.dtype)


def _vmem_budget():
    try:
        cap = int(pltpu.get_tpu_info().vmem_capacity_bytes)
    except Exception:
        cap = 64 << 20  # conservative fallback (v7x per-core VMEM)
    budget = int(cap * 0.70)                      # ~90 MiB (v5e/v6e), ~45 MiB (v7x)
    limit = min(cap - (4 << 20), int(cap * 0.80))  # scoped-VMEM limit with headroom
    return budget, limit


def _choose_tiles(N, K, Ep, x_item, w_item, out_item, budget, granule, single_buffer):
    # ---- E tiling: keep the whole weight resident when it fits, else tile E.
    e_units = Ep // 128
    te, e_tiles = Ep, 1
    w_budget = budget // 2
    if K * Ep * w_item > w_budget:
        te = 128
        for d in range(1, e_units + 1):
            if e_units % d:
                continue
            cand = (e_units // d) * 128
            if 2 * K * cand * w_item <= w_budget:  # double-buffered when tiled
                te = cand
                break
        e_tiles = Ep // te

    w_bufs = 1 if (e_tiles == 1 and single_buffer) else 2
    resident = w_bufs * (K * te * w_item + te * 4)
    avail = max(budget - resident, 1 << 20)

    # ---- N (row) tiling: as big as fits, prefer an exact divisor of N, >= 2 tiles.
    per_row = 2 * (K * x_item + te * out_item)     # double-buffered x / out tiles
    tn_max = max(granule, min(2048, (avail // per_row) // granule * granule))
    n_ceil = _round_up(N, granule)
    if n_ceil >= 2 * granule:
        tn_cap = min(tn_max, _round_up(_cdiv(n_ceil, 2), granule))  # v7x: both TCs get work
    else:
        tn_cap = min(tn_max, n_ceil)
    tn_cap = max(tn_cap, granule)

    tn = None
    if N % granule == 0:            # exact-divisor search -> no N pad, no de-pad slice
        q, limit, best, d = N // granule, tn_cap // granule, 0, 1
        while d * d <= q:
            if q % d == 0:
                for c in (d, q // d):
                    if c <= limit and c > best:
                        best = c
            d += 1
        if best:
            tn = best * granule
    if tn is None:
        tn = tn_cap
    n_tiles = _cdiv(N, tn)
    return tn, n_tiles, te, e_tiles


def patch_embed(x, weight, bias, patch_size, *, compute_dtype=jnp.bfloat16):
    """ViT patch embedding: Conv2d(C, E, kernel=stride=patch) -> (B, num_patches, E).

    x: (B, C, H, W); weight: (E, C, ph, pw); bias: (E,).
    MXU operands are cast to `compute_dtype` (default bf16; f32 accumulation and
    f32 bias add always). The output keeps x's original dtype (f32 for the module).
    """
    B, C, H, W = x.shape
    ph, pw = patch_size
    E = weight.shape[0]
    assert H % ph == 0 and W % pw == 0
    gh, gw = H // ph, W // pw
    num_patches = gh * gw
    out_dtype = x.dtype

    cdt = jnp.dtype(compute_dtype) if compute_dtype is not None else jnp.dtype(x.dtype)

    # --- im2col: reshape -> transpose -> reshape, rows flattened in (C, ph, pw)
    # order to match the conv-weight flatten order. With no K pad (and usually no
    # N pad, see divisor search) this lowers to a single fused XLA transpose+cast.
    # TODO(synk): folding this relayout into the kernel (grid over (B, gh), in-VMEM
    # (C,ph,gw,pw)->(gw,C*ph*pw) transpose) would drop one more HBM pass over x.
    xp = x.astype(cdt).reshape(B, C, gh, ph, gw, pw)
    xp = jnp.transpose(xp, (0, 2, 4, 1, 3, 5)).reshape(B * num_patches, C * ph * pw)

    N, K = xp.shape
    x_item = jnp.dtype(cdt).itemsize
    w_item = x_item
    out_item = jnp.dtype(out_dtype).itemsize
    granule = max(8, 32 // min(x_item, out_item))   # 8 rows (f32) / 16 rows (bf16)

    Ep = _round_up(E, 128)                          # lane-dense weight / output columns
    wm = jnp.pad(weight.astype(cdt).reshape(E, K).T, ((0, 0), (0, Ep - E)))
    bm = jnp.pad(bias.astype(jnp.float32).reshape(1, E), ((0, 0), (0, Ep - E)))

    budget, vmem_limit = _vmem_budget()

    def run(single_buffer):
        tn, n_tiles, te, e_tiles = _choose_tiles(
            N, K, Ep, x_item, w_item, out_item, budget, granule, single_buffer)
        Np = n_tiles * tn
        xpad = jnp.pad(xp, ((0, Np - N), (0, 0))) if Np != N else xp

        # Weight/bias block index is constant when e_tiles == 1 -> single buffer.
        const_w = ({"pipeline_mode": pl.Buffered(1)}
                   if (single_buffer and e_tiles == 1) else {})

        cost = pl.CostEstimate(
            flops=2 * Np * K * Ep,
            transcendentals=0,
            bytes_accessed=(e_tiles * Np * K * x_item + K * Ep * w_item
                            + Ep * 4 + Np * Ep * out_item),
        )
        return pl.pallas_call(
            _patch_embed_kernel,
            out_shape=jax.ShapeDtypeStruct((Np, Ep), out_dtype),
            grid_spec=pl.GridSpec(
                # E outermost (each weight slab loaded once, reused over all rows),
                # N innermost (activation tiles stream, double-buffered).
                grid=(e_tiles, n_tiles),
                in_specs=[
                    pl.BlockSpec((tn, K), lambda j, i: (i, 0)),             # x rows
                    pl.BlockSpec((K, te), lambda j, i: (0, j), **const_w),  # weight
                    pl.BlockSpec((1, te), lambda j, i: (0, j), **const_w),  # bias
                ],
                out_specs=pl.BlockSpec((tn, te), lambda j, i: (i, j)),
            ),
            compiler_params=pltpu.CompilerParams(
                dimension_semantics=("parallel", "parallel"),
                vmem_limit_bytes=vmem_limit,
            ),
            cost_estimate=cost,
        )(xpad, wm, bm)

    try:
        out = run(single_buffer=True)
    except Exception:
        # pl.Buffered(1) unsupported on this jax/Mosaic build: fall back to default
        # double-buffering (tiles re-sized with the matching VMEM accounting).
        out = run(single_buffer=False)

    # When tn divides N and E % 128 == 0 this slice is a metadata-only view.
    return out[:N, :E].reshape(B, num_patches, E)


if __name__ == "__main__":
    # Small shapes consistent with the module's forward:
    # img_size=(16,16), patch_size=(8,8), in_chans=4, embed_dim=32, batch=2
    B, C, H, W = 2, 4, 16, 16
    ph, pw = 8, 8
    E = 32

    key = jax.random.PRNGKey(0)
    kx, kw, kb = jax.random.split(key, 3)

    x = jax.random.normal(kx, (B, C, H, W), dtype=jnp.float32)
    # Shapes from nn.Conv2d(C, E, kernel_size=(ph,pw), stride=(ph,pw))
    weight = jax.random.normal(kw, (E, C, ph, pw), dtype=jnp.float32) * 0.02
    bias = jax.random.normal(kb, (E,), dtype=jnp.float32) * 0.02

    # plain-JAX reference (conv as patch-matmul), f32
    gh, gw = H // ph, W // pw
    xp_ref = jnp.transpose(x.reshape(B, C, gh, ph, gw, pw), (0, 2, 4, 1, 3, 5))
    ref = xp_ref.reshape(B, gh * gw, C * ph * pw) @ weight.reshape(E, -1).T + bias

    # default path: bf16 MXU operands, f32 accumulation, f32 output
    out_bf16 = jax.block_until_ready(patch_embed(x, weight, bias, (ph, pw)))
    assert out_bf16.shape == (B, gh * gw, E)
    assert out_bf16.dtype == jnp.float32
    assert jnp.allclose(out_bf16, ref, atol=2e-2, rtol=2e-2)

    # full-f32 path: bit-for-bit-tight against the reference
    out_f32 = jax.block_until_ready(
        patch_embed(x, weight, bias, (ph, pw), compute_dtype=jnp.float32))
    assert jnp.allclose(out_f32, ref, atol=1e-4, rtol=1e-4)

    print("KERNEL_OK")
</pallas_src>

<mosaic_0001>
module attributes {stable_mosaic.version = 11 : i64} {
  func.func @_patch_embed_kernel(%arg0: i32, %arg1: i32, %arg2: memref<16x256xbf16, #tpu.memory_space<vmem>>, %arg3: memref<256x128xbf16, #tpu.memory_space<vmem>>, %arg4: memref<1x128xf32, #tpu.memory_space<vmem>>, %arg5: memref<16x128xf32, #tpu.memory_space<vmem>>) attributes {dimension_semantics = [#tpu.dimension_semantics<parallel>, #tpu.dimension_semantics<parallel>], iteration_bounds = array<i64: 1, 1>, scalar_prefetch = 0 : i64, scratch_operands = 0 : i64, tpu.core_type = #tpu.core_type<tc>, window_params = [{transform_indices = @transform_0, window_bounds = array<i64: 16, 256>}, {pipeline_mode = #tpu.pipeline_mode<synchronous>, transform_indices = @transform_1, window_bounds = array<i64: 256, 128>}, {pipeline_mode = #tpu.pipeline_mode<synchronous>, transform_indices = @transform_2, window_bounds = array<i64: 1, 128>}, {transform_indices = @transform_3, window_bounds = array<i64: 16, 128>}]} {
    %c0 = arith.constant 0 : index
    %c0_0 = arith.constant 0 : index
    %0 = vector.load %arg2[%c0, %c0_0] : memref<16x256xbf16, #tpu.memory_space<vmem>>, vector<16x256xbf16>
    %c0_1 = arith.constant 0 : index
    %c0_2 = arith.constant 0 : index
    %1 = vector.load %arg3[%c0_1, %c0_2] : memref<256x128xbf16, #tpu.memory_space<vmem>>, vector<256x128xbf16>
    %cst = arith.constant dense<0.000000e+00> : vector<16x128xf32>
    %2 = tpu.matmul %0, %1, %cst {dimension_numbers = #tpu.dot_dimension_numbers<[1], [0], [0], [1], [0, 0, 1, 1], [], []>} : vector<16x256xbf16>, vector<256x128xbf16>, vector<16x128xf32> -> vector<16x128xf32>
    %c0_3 = arith.constant 0 : index
    %c0_4 = arith.constant 0 : index
    %3 = vector.load %arg4[%c0_3, %c0_4] : memref<1x128xf32, #tpu.memory_space<vmem>>, vector<1x128xf32>
    %4 = vector.broadcast %3 : vector<1x128xf32> to vector<16x128xf32>
    %5 = arith.addf %2, %4 : vector<16x128xf32>
    %c0_5 = arith.constant 0 : index
    %c0_6 = arith.constant 0 : index
    %6 = vector.load %arg5[%c0_5, %c0_6] : memref<16x128xf32, #tpu.memory_space<vmem>>, vector<16x128xf32>
    tpu.vector_store %arg5[%c0_5, %c0_6], %5 {strides = array<i32>} : memref<16x128xf32, #tpu.memory_space<vmem>>, vector<16x128xf32>,
    return
  }
  func.func @transform_0(%arg0: i32, %arg1: i32) -> (i32, i32) {
    %c0_i32 = arith.constant 0 : i32
    %c0_i32_0 = arith.constant 0 : i32
    return %arg1, %c0_i32 : i32, i32
  }
  func.func @transform_1(%arg0: i32, %arg1: i32) -> (i32, i32) {
    %c0_i32 = arith.constant 0 : i32
    %c0_i32_0 = arith.constant 0 : i32
    return %c0_i32, %arg0 : i32, i32
  }
  func.func @transform_2(%arg0: i32, %arg1: i32) -> (i32, i32) {
    %c0_i32 = arith.constant 0 : i32
    %c0_i32_0 = arith.constant 0 : i32
    return %c0_i32, %arg0 : i32, i32
  }
  func.func @transform_3(%arg0: i32, %arg1: i32) -> (i32, i32) {
    %c0_i32 = arith.constant 0 : i32
    return %arg1, %arg0 : i32, i32
  }
}

module attributes {stable_mosaic.version = 11 : i64} {
  func.func @_patch_embed_kernel(%arg0: i32, %arg1: i32, %arg2: memref<16x256xbf16, #tpu.memory_space<vmem>>, %arg3: memref<256x128xbf16, #tpu.memory_space<vmem>>, %arg4: memref<1x128xf32, #tpu.memory_space<vmem>>, %arg5: memref<16x128xf32, #tpu.memory_space<vmem>>) attributes {dimension_semantics = [#tpu.dimension_semantics<parallel>, #tpu.dimension_semantics<parallel>], iteration_bounds = array<i64: 1, 1>, scalar_prefetch = 0 : i64, scratch_operands = 0 : i64, tpu.core_type = #tpu.core_type<tc>, window_params = [{transform_indices = @transform_0, window_bounds = array<i64: 16, 256>}, {transform_indices = @transform_1, window_bounds = array<i64: 256, 128>}, {transform_indices = @transform_2, window_bounds = array<i64: 1, 128>}, {transform_indices = @transform_3, window_bounds = array<i64: 16, 128>}]} {
    %c0 = arith.constant 0 : index
    %c0_0 = arith.constant 0 : index
    %0 = vector.load %arg2[%c0, %c0_0] : memref<16x256xbf16, #tpu.memory_space<vmem>>, vector<16x256xbf16>
    %c0_1 = arith.constant 0 : index
    %c0_2 = arith.constant 0 : index
    %1 = vector.load %arg3[%c0_1, %c0_2] : memref<256x128xbf16, #tpu.memory_space<vmem>>, vector<256x128xbf16>
    %cst = arith.constant dense<0.000000e+00> : vector<16x128xf32>
    %2 = tpu.matmul %0, %1, %cst {dimension_numbers = #tpu.dot_dimension_numbers<[1], [0], [0], [1], [0, 0, 1, 1], [], []>} : vector<16x256xbf16>, vector<256x128xbf16>, vector<16x128xf32> -> vector<16x128xf32>
    %c0_3 = arith.constant 0 : index
    %c0_4 = arith.constant 0 : index
    %3 = vector.load %arg4[%c0_3, %c0_4] : memref<1x128xf32, #tpu.memory_space<vmem>>, vector<1x128xf32>
    %4 = vector.broadcast %3 : vector<1x128xf32> to vector<16x128xf32>
    %5 = arith.addf %2, %4 : vector<16x128xf32>
    %c0_5 = arith.constant 0 : index
    %c0_6 = arith.constant 0 : index
    %6 = vector.load %arg5[%c0_5, %c0_6] : memref<16x128xf32, #tpu.memory_space<vmem>>, vector<16x128xf32>
    tpu.vector_store %arg5[%c0_5, %c0_6], %5 {strides = array<i32>} : memref<16x128xf32, #tpu.memory_space<vmem>>, vector<16x128xf32>,
    return
  }
  func.func @transform_0(%arg0: i32, %arg1: i32) -> (i32, i32) {
    %c0_i32 = arith.constant 0 : i32
    %c0_i32_0 = arith.constant 0 : i32
    return %arg1, %c0_i32 : i32, i32
  }
  func.func @transform_1(%arg0: i32, %arg1: i32) -> (i32, i32) {
    %c0_i32 = arith.constant 0 : i32
    %c0_i32_0 = arith.constant 0 : i32
    return %c0_i32, %arg0 : i32, i32
  }
  func.func @transform_2(%arg0: i32, %arg1: i32) -> (i32, i32) {
    %c0_i32 = arith.constant 0 : i32
    %c0_i32_0 = arith.constant 0 : i32
    return %c0_i32, %arg0 : i32, i32
  }
  func.func @transform_3(%arg0: i32, %arg1: i32) -> (i32, i32) {
    %c0_i32 = arith.constant 0 : i32
    return %arg1, %arg0 : i32, i32
  }
}

</mosaic_0001>

<bundles_post_ra>
// kernel: tpu_custom_call.1
= control target key start
LH: loop header
LB: loop body
LE: loop exit
PB: predicated region body
PF: predicated region fallthrough
CT: control target
= control target key end

     0   :  { %8 = vsyncpa [#allocation3], 0  ;;  %s430_s0 = inlined_call_operand.hbm [shape: bf16[16,256], index: 0, kind: input, shape index: {}]   ;;  %s431_s1 = inlined_call_operand.hbm [shape: bf16[256,128], index: 1, kind: input, shape index: {}]   ;;  %s432_s2 = inlined_call_operand.vmem [shape: f32[1,128], index: 2, kind: input, shape index: {}]   ;;  %s433_s3 = inlined_call_operand.hbm [shape: f32[16,128], index: 3, kind: output, shape index: {}]  }
   0x1   :  { %9 = vsyncpa [#allocation6], 0 }
   0x2   :  { %10 = vsyncpa [#allocation4], 0  ;;  %s385_s12 = smov [#allocation2]  }
   0x3   :  { %s16_s13 = sshll.u32 %s385_s12, 4  ;;  %s17_s13 = int_to_ptr.vmem [resolvable:$true] %s16_s13 }
   0x4   :  { %s327_s14 = scalar_lea.vmem %s17_s13, 256  ;;  %p332_p1 = scmp.lt.s32.totalorder %s17_s13, %s17_s13 }
   0x5   :  { %p328_p0 = scmp.ne.s32.totalorder %s17_s13, %s327_s14  ;;  %p333_p2 = scmp.lt.s32.totalorder %s327_s14, %s327_s14 }
   0x7   :  { %p334_p3 = por %p333_p2, %p332_p1 }
   0x9   :  { %p335_p4 = pnand %p334_p3, %p328_p0 }
   0xb   :  { %338 = shalt.err (!%p335_p4)
}
   0xc   :  { %s386_s15 = smov 128   ;;  %s387_s16 = smov 8  }
   0xd   :  { %22 = dma.hbm_to_vmem [thread:$0]  %s430_s0, 256, %s17_s13, [#allocation3], %s386_s15, %s386_s15, %s387_s16  }
   0xe   :  { %s388_s19 = smov [#allocation5]  }
   0xf   :  { %s28_s20 = sshll.u32 %s388_s19, 4  ;;  %s29_s20 = int_to_ptr.vmem [resolvable:$true] %s28_s20 }
  0x10   :  { %s347_s21 = scalar_lea.vmem %s29_s20, 2048  ;;  %p352_p6 = scmp.lt.s32.totalorder %s29_s20, %s29_s20 }
  0x11   :  { %p348_p5 = scmp.ne.s32.totalorder %s29_s20, %s347_s21  ;;  %p353_p7 = scmp.lt.s32.totalorder %s347_s21, %s347_s21 }
  0x13   :  { %p354_p8 = por %p353_p7, %p352_p6 }
  0x15   :  { %p355_p9 = pnand %p354_p8, %p348_p5 }
  0x17   :  { %358 = shalt.err (!%p355_p9)
}
  0x18   :  { %s389_s22 = smov 64   ;;  %s390_s23 = smov 4  }
  0x19   :  { %34 = dma.hbm_to_vmem [thread:$0]  %s431_s1, 2048, %s29_s20, [#allocation6], %s389_s22, %s389_s22, %s390_s23  }
  0x1a   :  { %379 = dma.done.wait [#allocation3], 256  }
  0x1b   :  { %380 = vsyncadd [#allocation3], 4294967040 }
  0x1c   :  { %381 = dma.done.wait [#allocation6], 2048  }
  0x1d   :  { %382 = vsyncadd [#allocation6], 4294965248  ;;  %v300_v0 = vld [vmem:[#allocation5 + $0x78] sm:$0xff]   ;;  %v302_v2 = vld [vmem:[#allocation5 + $0x70] sm:$0xff]   ;;  %s391_s26 = smov [#allocation7]  }
  0x1e   :  { %v301_v1 = vld [vmem:[#allocation5 + $0x38] sm:$0xff]   ;;  %271 = vmatprep.subr.bf16.mxu0 %v300_v0  ;;  %v303_v3 = vld [vmem:[#allocation5 + $0x30] sm:$0xff]   ;;  %v304_v4 = vld [vmem:[#allocation5 + $0x68] sm:$0xff]   ;;  %s239_s27 = sshll.u32 %s391_s26, 4  ;;  %s240_s27 = int_to_ptr.vmem [resolvable:$true] %s239_s27 }
  0x1f   :  { %272 = vmatpush3.bf16.msra.mxu0 %v301_v1  ;;  %v305_v5 = vld [vmem:[#allocation5 + $0x28] sm:$0xff]   ;;  %v306_v6 = vld [vmem:[#allocation5 + $0x60] sm:$0xff]   ;;  %v308_v8 = vld [vmem:[#allocation5 + $0x58] sm:$0xff]   ;;  %s359_s28 = scalar_lea.vmem %s240_s27, 256  ;;  %p364_p11 = scmp.lt.s32.totalorder %s240_s27, %s240_s27 }
  0x20   :  { %273 = vmatprep.subr.bf16.mxu0 %v302_v2  ;;  %v307_v7 = vld [vmem:[#allocation5 + $0x20] sm:$0xff]   ;;  %v309_v9 = vld [vmem:[#allocation5 + $0x18] sm:$0xff]   ;;  %v310_v10 = vld [vmem:[#allocation5 + $0x50] sm:$0xff]   ;;  %p360_p10 = scmp.ne.s32.totalorder %s240_s27, %s359_s28  ;;  %p365_p12 = scmp.lt.s32.totalorder %s359_s28, %s359_s28 }
  0x21   :  { %v318_v11 = vld [vmem:[#allocation2 + $0x4] ss:$8 sps:$4 sm:$0xff]   ;;  %v312_v13 = vld [vmem:[#allocation5 + $0x48] sm:$0xff]   ;;  %v314_v15 = vld [vmem:[#allocation5 + $0x40] sm:$0xff]  }
  0x22   :  { %v311_v12 = vld [vmem:[#allocation5 + $0x10] sm:$0xff]   ;;  %223 = vmatprep.mubr.bf16.mxu0 %v318_v11  ;;  %v313_v14 = vld [vmem:[#allocation5 + $0x8] sm:$0xff]   ;;  %v315_v16 = vld [vmem:[#allocation5] sm:$0xff]   ;;  %p366_p13 = por %p365_p12, %p364_p11 }
  0x23   :  { %274 = vmatpush3.bf16.msra.mxu0 %v303_v3  ;;  %v316_v17 = vld [vmem:[#allocation2] ss:$8 sps:$4 sm:$0xff]  }
  0x24   :  { %275 = vmatprep.subr.bf16.mxu0 %v304_v4  ;;  %v252_v19 = vld [vmem:[%s432_s2] ss:$0 sm:$0xff]  ;;  %p367_p0 = pnand %p366_p13, %p360_p10 }
  0x27   :  { %276 = vmatpush3.bf16.msra.mxu0 %v305_v5 }
  0x28   :  { %277 = vmatprep.subr.bf16.mxu0 %v306_v6 }
  0x2b   :  { %278 = vmatpush3.bf16.msra.mxu0 %v307_v7 }
  0x2c   :  { %279 = vmatprep.subr.bf16.mxu0 %v308_v8 }
  0x2f   :  { %280 = vmatpush3.bf16.msra.mxu0 %v309_v9 }
  0x30   :  { %281 = vmatprep.subr.bf16.mxu0 %v310_v10 }
  0x33   :  { %282 = vmatpush3.bf16.msra.mxu0 %v311_v12 }
  0x34   :  { %283 = vmatprep.subr.bf16.mxu0 %v312_v13 }
  0x37   :  { %284 = vmatpush3.bf16.msra.mxu0 %v313_v14 }
  0x38   :  { %285 = vmatprep.subr.bf16.mxu0 %v314_v15 }
  0x3b   :  { %286 = vmatpush3.bf16.msra.mxu0 %v315_v16 }
  0x3e   :  { %224 = vmatmul.mubr.bf16.vlgmr.msra.gmra.mxu0 %v316_v17 }
  0xfe   :  { %v287_v18 = vpop.f32.mrf.mxu0 }
 0x100   :  { %v288_v20 = vpop.f32.mrf.mxu0 }
 0x101   :  { %v289_v21 = vadd.f32 %v288_v20, %v287_v18 }
 0x102   :  { %v290_v22 = vpop.f32.mrf.mxu0 }
 0x103   :  { %v226_v23 = vadd.f32 %v289_v21, %v252_v19 }
 0x104   :  { %v291_v24 = vpop.f32.mrf.mxu0 }
 0x105   :  { %232 = vst [vmem:[#allocation7] sm:$0xff] %v226_v23  ;;  %v292_v25 = vadd.f32 %v291_v24, %v290_v22 }
 0x107   :  { %v229_v26 = vadd.f32 %v292_v25, %v252_v19 }
 0x109   :  { %233 = vst [vmem:[#allocation7 + $0x8] sm:$0xff] %v229_v26 }
 0x10a   :  { %370 = shalt.err (!%p367_p0)
}
 0x10b   :  { %245 = dma.vmem_to_hbm [thread:$0]  %s240_s27, 256, %s433_s3, [#allocation4], %s386_s15, %s386_s15, %s387_s16  }
 0x10c   :  { %383 = dma.done.wait [#allocation4], 256  }
 0x10d   :  { %384 = vsyncadd [#allocation4], 4294967040 }
 0x10e   :  { %249 = vsyncpa [#allocation3], 1 }
 0x10f   :  { %250 = vsyncpa [#allocation6], 1 }
 0x110   :  { %251 = vsyncpa [#allocation4], 1 }

// kernel: tpu_custom_call.1
= control target key start
LH: loop header
LB: loop body
LE: loop exit
PB: predicated region body
PF: predicated region fallthrough
CT: control target
= control target key end

     0   :  { %8 = vsyncpa [#allocation3], 0  ;;  %s430_s0 = inlined_call_operand.hbm [shape: bf16[16,256], index: 0, kind: input, shape index: {}]   ;;  %s431_s1 = inlined_call_operand.hbm [shape: bf16[256,128], index: 1, kind: input, shape index: {}]   ;;  %s432_s2 = inlined_call_operand.vmem [shape: f32[1,128], index: 2, kind: input, shape index: {}]   ;;  %s433_s3 = inlined_call_operand.hbm [shape: f32[16,128], index: 3, kind: output, shape index: {}]  }
   0x1   :  { %9 = vsyncpa [#allocation6], 0 }
   0x2   :  { %10 = vsyncpa [#allocation4], 0  ;;  %s385_s12 = smov [#allocation2]  }
   0x3   :  { %s16_s13 = sshll.u32 %s385_s12, 4  ;;  %s17_s13 = int_to_ptr.vmem [resolvable:$true] %s16_s13 }
   0x4   :  { %s327_s14 = scalar_lea.vmem %s17_s13, 256  ;;  %p332_p1 = scmp.lt.s32.totalorder %s17_s13, %s17_s13 }
   0x5   :  { %p328_p0 = scmp.ne.s32.totalorder %s17_s13, %s327_s14  ;;  %p333_p2 = scmp.lt.s32.totalorder %s327_s14, %s327_s14 }
   0x7   :  { %p334_p3 = por %p333_p2, %p332_p1 }
   0x9   :  { %p335_p4 = pnand %p334_p3, %p328_p0 }
   0xb   :  { %338 = shalt.err (!%p335_p4)
}
   0xc   :  { %s386_s15 = smov 128   ;;  %s387_s16 = smov 8  }
   0xd   :  { %22 = dma.hbm_to_vmem [thread:$0]  %s430_s0, 256, %s17_s13, [#allocation3], %s386_s15, %s386_s15, %s387_s16  }
   0xe   :  { %s388_s19 = smov [#allocation5]  }
   0xf   :  { %s28_s20 = sshll.u32 %s388_s19, 4  ;;  %s29_s20 = int_to_ptr.vmem [resolvable:$true] %s28_s20 }
  0x10   :  { %s347_s21 = scalar_lea.vmem %s29_s20, 2048  ;;  %p352_p6 = scmp.lt.s32.totalorder %s29_s20, %s29_s20 }
  0x11   :  { %p348_p5 = scmp.ne.s32.totalorder %s29_s20, %s347_s21  ;;  %p353_p7 = scmp.lt.s32.totalorder %s347_s21, %s347_s21 }
  0x13   :  { %p354_p8 = por %p353_p7, %p352_p6 }
  0x15   :  { %p355_p9 = pnand %p354_p8, %p348_p5 }
  0x17   :  { %358 = shalt.err (!%p355_p9)
}
  0x18   :  { %s389_s22 = smov 64   ;;  %s390_s23 = smov 4  }
  0x19   :  { %34 = dma.hbm_to_vmem [thread:$0]  %s431_s1, 2048, %s29_s20, [#allocation6], %s389_s22, %s389_s22, %s390_s23  }
  0x1a   :  { %379 = dma.done.wait [#allocation3], 256  }
  0x1b   :  { %380 = vsyncadd [#allocation3], 4294967040 }
  0x1c   :  { %381 = dma.done.wait [#allocation6], 2048  }
  0x1d   :  { %382 = vsyncadd [#allocation6], 4294965248  ;;  %v300_v0 = vld [vmem:[#allocation5 + $0x78] sm:$0xff]   ;;  %v302_v2 = vld [vmem:[#allocation5 + $0x70] sm:$0xff]   ;;  %s391_s26 = smov [#allocation7]  }
  0x1e   :  { %v301_v1 = vld [vmem:[#allocation5 + $0x38] sm:$0xff]   ;;  %271 = vmatprep.subr.bf16.mxu0 %v300_v0  ;;  %v303_v3 = vld [vmem:[#allocation5 + $0x30] sm:$0xff]   ;;  %v304_v4 = vld [vmem:[#allocation5 + $0x68] sm:$0xff]   ;;  %s239_s27 = sshll.u32 %s391_s26, 4  ;;  %s240_s27 = int_to_ptr.vmem [resolvable:$true] %s239_s27 }
  0x1f   :  { %272 = vmatpush3.bf16.msra.mxu0 %v301_v1  ;;  %v305_v5 = vld [vmem:[#allocation5 + $0x28] sm:$0xff]   ;;  %v306_v6 = vld [vmem:[#allocation5 + $0x60] sm:$0xff]   ;;  %v308_v8 = vld [vmem:[#allocation5 + $0x58] sm:$0xff]   ;;  %s359_s28 = scalar_lea.vmem %s240_s27, 256  ;;  %p364_p11 = scmp.lt.s32.totalorder %s240_s27, %s240_s27 }
  0x20   :  { %273 = vmatprep.subr.bf16.mxu0 %v302_v2  ;;  %v307_v7 = vld [vmem:[#allocation5 + $0x20] sm:$0xff]   ;;  %v309_v9 = vld [vmem:[#allocation5 + $0x18] sm:$0xff]   ;;  %v310_v10 = vld [vmem:[#allocation5 + $0x50] sm:$0xff]   ;;  %p360_p10 = scmp.ne.s32.totalorder %s240_s27, %s359_s28  ;;  %p365_p12 = scmp.lt.s32.totalorder %s359_s28, %s359_s28 }
  0x21   :  { %v318_v11 = vld [vmem:[#allocation2 + $0x4] ss:$8 sps:$4 sm:$0xff]   ;;  %v312_v13 = vld [vmem:[#allocation5 + $0x48] sm:$0xff]   ;;  %v314_v15 = vld [vmem:[#allocation5 + $0x40] sm:$0xff]  }
  0x22   :  { %v311_v12 = vld [vmem:[#allocation5 + $0x10] sm:$0xff]   ;;  %223 = vmatprep.mubr.bf16.mxu0 %v318_v11  ;;  %v313_v14 = vld [vmem:[#allocation5 + $0x8] sm:$0xff]   ;;  %v315_v16 = vld [vmem:[#allocation5] sm:$0xff]   ;;  %p366_p13 = por %p365_p12, %p364_p11 }
  0x23   :  { %274 = vmatpush3.bf16.msra.mxu0 %v303_v3  ;;  %v316_v17 = vld [vmem:[#allocation2] ss:$8 sps:$4 sm:$0xff]  }
  0x24   :  { %275 = vmatprep.subr.bf16.mxu0 %v304_v4  ;;  %v252_v19 = vld [vmem:[%s432_s2] ss:$0 sm:$0xff]  ;;  %p367_p0 = pnand %p366_p13, %p360_p10 }
  0x27   :  { %276 = vmatpush3.bf16.msra.mxu0 %v305_v5 }
  0x28   :  { %277 = vmatprep.subr.bf16.mxu0 %v306_v6 }
  0x2b   :  { %278 = vmatpush3.bf16.msra.mxu0 %v307_v7 }
  0x2c   :  { %279 = vmatprep.subr.bf16.mxu0 %v308_v8 }
  0x2f   :  { %280 = vmatpush3.bf16.msra.mxu0 %v309_v9 }
  0x30   :  { %281 = vmatprep.subr.bf16.mxu0 %v310_v10 }
  0x33   :  { %282 = vmatpush3.bf16.msra.mxu0 %v311_v12 }
  0x34   :  { %283 = vmatprep.subr.bf16.mxu0 %v312_v13 }
  0x37   :  { %284 = vmatpush3.bf16.msra.mxu0 %v313_v14 }
  0x38   :  { %285 = vmatprep.subr.bf16.mxu0 %v314_v15 }
  0x3b   :  { %286 = vmatpush3.bf16.msra.mxu0 %v315_v16 }
  0x3e   :  { %224 = vmatmul.mubr.bf16.vlgmr.msra.gmra.mxu0 %v316_v17 }
  0xfe   :  { %v287_v18 = vpop.f32.mrf.mxu0 }
 0x100   :  { %v288_v20 = vpop.f32.mrf.mxu0 }
 0x101   :  { %v289_v21 = vadd.f32 %v288_v20, %v287_v18 }
 0x102   :  { %v290_v22 = vpop.f32.mrf.mxu0 }
 0x103   :  { %v226_v23 = vadd.f32 %v289_v21, %v252_v19 }
 0x104   :  { %v291_v24 = vpop.f32.mrf.mxu0 }
 0x105   :  { %232 = vst [vmem:[#allocation7] sm:$0xff] %v226_v23  ;;  %v292_v25 = vadd.f32 %v291_v24, %v290_v22 }
 0x107   :  { %v229_v26 = vadd.f32 %v292_v25, %v252_v19 }
 0x109   :  { %233 = vst [vmem:[#allocation7 + $0x8] sm:$0xff] %v229_v26 }
 0x10a   :  { %370 = shalt.err (!%p367_p0)
}
 0x10b   :  { %245 = dma.vmem_to_hbm [thread:$0]  %s240_s27, 256, %s433_s3, [#allocation4], %s386_s15, %s386_s15, %s387_s16  }
 0x10c   :  { %383 = dma.done.wait [#allocation4], 256  }
 0x10d   :  { %384 = vsyncadd [#allocation4], 4294967040 }
 0x10e   :  { %249 = vsyncpa [#allocation3], 1 }
 0x10f   :  { %250 = vsyncpa [#allocation6], 1 }
 0x110   :  { %251 = vsyncpa [#allocation4], 1 }

</bundles_post_ra>
